<compile_context>
chip_gen: v7x
topology: tpu7x:2x2x1
jax: 0.10.0
libtpu: 0.0.40
codegen_flags: <defaults>
</compile_context>

<pallas_src>
import numpy as np
import jax
import jax.numpy as jnp
from jax.experimental import pallas as pl
from jax.experimental.pallas import tpu as pltpu


def cosine_beta_schedule(timesteps, s=0.008):
    steps = timesteps + 1
    x = np.linspace(0, steps, steps, dtype=np.float64)
    alphas_cumprod = np.cos(((x / steps) + s) / (1 + s) * np.pi * 0.5) ** 2
    alphas_cumprod = alphas_cumprod / alphas_cumprod[0]
    betas = 1.0 - (alphas_cumprod[1:] / alphas_cumprod[:-1])
    return np.clip(betas, 0.0, 0.999)


def _bh_tiling(bh, max_tile=512):
    """Lane-dense tiling of the flattened B*H axis (multiples of 128)."""
    lane = 128
    tile = min(max_tile, ((bh + lane - 1) // lane) * lane)
    pad = ((bh + tile - 1) // tile) * tile
    return tile, pad


def diffusion_step_kernel(coef_ref, mask_ref, w1t_ref, w2t_ref, temb_ref,
                          noise_ref, xinit_ref, out_ref, x_acc):
    # grid = (bh_tile_idx, t_idx); t_idx runs 0..T-1 and maps to timestep T-1-t_idx.
    ti = pl.program_id(1)
    n_t = pl.num_programs(1)
    tstep = n_t - 1 - ti

    @pl.when(ti == 0)
    def _():
        x_acc[...] = xinit_ref[...]

    # per-step scalars (dynamic SMEM reads, cheap)
    src = coef_ref[0, tstep]     # sqrt_recip_alphas_cumprod[t]
    srm1 = coef_ref[1, tstep]    # sqrt_recipm1_alphas_cumprod[t]
    c1 = coef_ref[2, tstep]      # posterior_mean_coef1[t]
    c2 = coef_ref[3, tstep]      # posterior_mean_coef2[t]
    std = coef_ref[4, tstep]     # exp(0.5 * log_var)[t]; == 0 at t == 0 (noise gate)

    x = x_acc[...]                                        # (D, BH_TILE) f32
    xb = x.astype(jnp.bfloat16)

    # model(x, cond, t): synthetic denoiser  eps = W2^T tanh(W1^T x + temb[t])
    h = jnp.tanh(
        jnp.dot(w1t_ref[...], xb, preferred_element_type=jnp.float32)
        + temb_ref[0])                                    # (HID, BH_TILE) f32
    eps = jnp.dot(w2t_ref[...], h.astype(jnp.bfloat16),
                  preferred_element_type=jnp.float32)     # (D, BH_TILE) f32

    # predict_start_from_noise (predict_epsilon=True, clip_denoised=False -> no clamp)
    x_recon = src * x - srm1 * eps
    # q_posterior mean; sample_fn: mean + std * noise (std[t==0] == 0)
    sampled = c1 * x_recon + c2 * x + std * noise_ref[0]

    # only diffusion_dims channels are written back
    m = jnp.broadcast_to(mask_ref[...], x.shape)          # f32 lane-broadcast, once/step
    x_acc[...] = jnp.where(m != 0.0, sampled, x)

    @pl.when(ti == n_t - 1)
    def _():
        out_ref[...] = x_acc[...]


def gaussian_diffusion_sample(x_init, noise_cm, coefs, mask, w1, w2, temb):
    """x_init (B,H,D), noise_cm (T,D,BH_pad) channel-major per-step noise, coefs (5,T)
    [sqrt_recip_ac, sqrt_recipm1_ac, post_coef1, post_coef2, std (std[0]=0)],
    mask (1,D), w1 (D,HID), w2 (HID,D), temb (T,HID).  Returns (B,H,D)."""
    B, H, D = x_init.shape
    T, HID = temb.shape
    BH = B * H
    bh_tile, bh_pad = _bh_tiling(BH)
    assert noise_cm.shape == (T, D, bh_pad), (noise_cm.shape, (T, D, bh_pad))

    # wrapper-side layout plumbing (small arrays only; the noise stream is already
    # channel-major so the dominant HBM tensor is never transposed)
    x_cm = jnp.pad(x_init.reshape(BH, D).T, ((0, 0), (0, bh_pad - BH)))  # (D, BH_pad)
    mask_cm = mask.T                                                      # (D, 1)
    w1t = w1.T.astype(jnp.bfloat16)                                       # (HID, D)
    w2t = w2.T.astype(jnp.bfloat16)                                       # (D, HID)
    temb_col = temb.reshape(T, HID, 1)                                    # (T, HID, 1)

    n_tiles = bh_pad // bh_tile
    out_cm = pl.pallas_call(
        diffusion_step_kernel,
        out_shape=jax.ShapeDtypeStruct((D, bh_pad), jnp.float32),
        grid=(n_tiles, T),
        in_specs=[
            pl.BlockSpec(memory_space=pltpu.MemorySpace.SMEM),              # coefs (5,T)
            pl.BlockSpec((D, 1), lambda j, ti: (0, 0)),                     # mask
            pl.BlockSpec((HID, D), lambda j, ti: (0, 0)),                   # W1^T (bf16)
            pl.BlockSpec((D, HID), lambda j, ti: (0, 0)),                   # W2^T (bf16)
            pl.BlockSpec((1, HID, 1), lambda j, ti: (T - 1 - ti, 0, 0)),    # temb[t]
            pl.BlockSpec((1, D, bh_tile), lambda j, ti: (T - 1 - ti, 0, j)),  # noise[t]
            pl.BlockSpec((D, bh_tile), lambda j, ti: (0, j)),               # x_init tile
        ],
        out_specs=pl.BlockSpec((D, bh_tile), lambda j, ti: (0, j)),
        scratch_shapes=[pltpu.VMEM((D, bh_tile), jnp.float32)],             # carried x
        compiler_params=pltpu.CompilerParams(
            dimension_semantics=("parallel", "arbitrary")),
    )(coefs, mask_cm, w1t, w2t, temb_col, noise_cm, x_cm)

    return out_cm[:, :BH].T.reshape(B, H, D)


if __name__ == "__main__":
    B, H, D = 2, 16, 8          # batch, horizon, transition_dim
    HID = 32                    # hidden width of the synthetic denoiser
    T = 16                      # n_timesteps (small for the demo)
    diffusion_dims = [2, 3, 4, 5, 6, 7]
    BH = B * H
    _, bh_pad = _bh_tiling(BH)

    # ---- schedule buffers, matching GaussianDiffusion.__init__ ----
    betas = cosine_beta_schedule(T)
    alphas = 1.0 - betas
    alphas_cumprod = np.cumprod(alphas)
    alphas_cumprod_prev = np.concatenate([np.ones(1), alphas_cumprod[:-1]])
    sqrt_recip_ac = np.sqrt(1.0 / alphas_cumprod)
    sqrt_recipm1_ac = np.sqrt(1.0 / alphas_cumprod - 1.0)
    post_var = betas * (1.0 - alphas_cumprod_prev) / (1.0 - alphas_cumprod)
    post_logvar = np.log(np.clip(post_var, 1e-20, None))
    post_std = np.exp(0.5 * post_logvar)
    post_std[0] = 0.0           # sample_fn: noise[t == 0] = 0  -> gate via zeroed std
    coef1 = betas * np.sqrt(alphas_cumprod_prev) / (1.0 - alphas_cumprod)
    coef2 = (1.0 - alphas_cumprod_prev) * np.sqrt(alphas) / (1.0 - alphas_cumprod)
    coefs = jnp.asarray(
        np.stack([sqrt_recip_ac, sqrt_recipm1_ac, coef1, coef2, post_std]).astype(np.float32))

    # ---- deterministic synthetic inputs / model params ----
    key = jax.random.PRNGKey(0)
    k_init, k_noise, k_w1, k_w2, k_temb, k_traj = jax.random.split(key, 6)
    w1 = (jax.random.normal(k_w1, (D, HID)) * 0.3).astype(jnp.float32)
    w2 = (jax.random.normal(k_w2, (HID, D)) * 0.3).astype(jnp.float32)
    temb = (jax.random.normal(k_temb, (T, HID)) * 0.3).astype(jnp.float32)

    mask_np = np.zeros((1, D), np.float32)
    mask_np[0, diffusion_dims] = 1.0
    mask = jnp.asarray(mask_np)

    init_traj = jax.random.normal(k_traj, (B, H, D), jnp.float32)
    init_noise = jax.random.normal(k_init, (B, H, D), jnp.float32)
    # p_sample_loop init: x = init.clone(); x[:, :, diffusion_dims] = randn  (glue)
    x_init = mask * init_noise + (1.0 - mask) * init_traj
    # per-step sampling noise, generated DIRECTLY channel-major (T, D, BH_pad) so the
    # dominant HBM stream never needs a wrapper-side transpose
    noise_cm = jax.random.normal(k_noise, (T, D, bh_pad), jnp.float32)

    # ---- pure-JAX reference of the same reverse loop (same bf16 operands / f32 acc) ----
    w1_bf = w1.astype(jnp.bfloat16)
    w2_bf = w2.astype(jnp.bfloat16)

    def ref_loop(x):
        for t in reversed(range(T)):
            xb = x.reshape(BH, D).astype(jnp.bfloat16)
            h = jnp.tanh(jnp.dot(xb, w1_bf, preferred_element_type=jnp.float32) + temb[t])
            eps = jnp.dot(h.astype(jnp.bfloat16), w2_bf,
                          preferred_element_type=jnp.float32).reshape(B, H, D)
            x_recon = coefs[0, t] * x - coefs[1, t] * eps
            mean = coefs[2, t] * x_recon + coefs[3, t] * x
            nz = noise_cm[t, :, :BH].T.reshape(B, H, D)
            x = jnp.where(mask > 0, mean + coefs[4, t] * nz, x)   # coefs[4,0] == 0
        return x

    x_ref = jax.block_until_ready(ref_loop(x_init))

    x_out = jax.block_until_ready(
        gaussian_diffusion_sample(x_init, noise_cm, coefs, mask, w1, w2, temb))

    assert jnp.all(jnp.isfinite(x_out))
    max_err = float(jnp.max(jnp.abs(x_out - x_ref)))
    assert jnp.allclose(x_out, x_ref, atol=5e-2, rtol=5e-2), max_err
    print("KERNEL_OK")
</pallas_src>

<mosaic_0001>
module attributes {stable_mosaic.version = 11 : i64} {
  func.func @diffusion_step_kernel(%arg0: i32, %arg1: i32, %arg2: memref<5x16xf32, #tpu.memory_space<smem>>, %arg3: memref<8x1xf32, #tpu.memory_space<vmem>>, %arg4: memref<32x8xbf16, #tpu.memory_space<vmem>>, %arg5: memref<8x32xbf16, #tpu.memory_space<vmem>>, %arg6: memref<1x32x1xf32, #tpu.memory_space<vmem>>, %arg7: memref<1x8x128xf32, #tpu.memory_space<vmem>>, %arg8: memref<8x128xf32, #tpu.memory_space<vmem>>, %arg9: memref<8x128xf32, #tpu.memory_space<vmem>>, %arg10: memref<8x128xf32, #tpu.memory_space<vmem>>) attributes {dimension_semantics = [#tpu.dimension_semantics<parallel>, #tpu.dimension_semantics<arbitrary>], iteration_bounds = array<i64: 1, 16>, scalar_prefetch = 0 : i64, scratch_operands = 1 : i64, tpu.core_type = #tpu.core_type<tc>, window_params = [{transform_indices = @transform_0, window_bounds = array<i64: 5, 16>}, {pipeline_mode = #tpu.pipeline_mode<synchronous>, transform_indices = @transform_1, window_bounds = array<i64: 8, 1>}, {pipeline_mode = #tpu.pipeline_mode<synchronous>, transform_indices = @transform_2, window_bounds = array<i64: 32, 8>}, {pipeline_mode = #tpu.pipeline_mode<synchronous>, transform_indices = @transform_3, window_bounds = array<i64: 8, 32>}, {transform_indices = @transform_4, window_bounds = array<i64: 1, 32, 1>}, {transform_indices = @transform_5, window_bounds = array<i64: 1, 8, 128>}, {transform_indices = @transform_6, window_bounds = array<i64: 8, 128>}, {transform_indices = @transform_7, window_bounds = array<i64: 8, 128>}]} {
    %c15_i32 = arith.constant 15 : i32
    %0 = arith.subi %c15_i32, %arg1 : i32
    %c0_i32 = arith.constant 0 : i32
    %1 = arith.cmpi eq, %arg1, %c0_i32 : i32
    %2 = arith.extui %1 : i1 to i32
    %c0_i32_0 = arith.constant 0 : i32
    %3 = arith.cmpi ne, %2, %c0_i32_0 : i32
    scf.if %3 {
      %c0_21 = arith.constant 0 : index
      %c0_22 = arith.constant 0 : index
      %51 = vector.load %arg8[%c0_21, %c0_22] : memref<8x128xf32, #tpu.memory_space<vmem>>, vector<8x128xf32>
      %c0_23 = arith.constant 0 : index
      %c0_24 = arith.constant 0 : index
      %52 = vector.load %arg10[%c0_23, %c0_24] : memref<8x128xf32, #tpu.memory_space<vmem>>, vector<8x128xf32>
      tpu.vector_store %arg10[%c0_23, %c0_24], %51 {strides = array<i32>} : memref<8x128xf32, #tpu.memory_space<vmem>>, vector<8x128xf32>,
    } else {
    }
    %c0 = arith.constant 0 : index
    %4 = arith.index_cast %0 : i32 to index
    %5 = memref.load %arg2[%c0, %4] : memref<5x16xf32, #tpu.memory_space<smem>>
    %c1 = arith.constant 1 : index
    %6 = arith.index_cast %0 : i32 to index
    %7 = memref.load %arg2[%c1, %6] : memref<5x16xf32, #tpu.memory_space<smem>>
    %c2 = arith.constant 2 : index
    %8 = arith.index_cast %0 : i32 to index
    %9 = memref.load %arg2[%c2, %8] : memref<5x16xf32, #tpu.memory_space<smem>>
    %c3 = arith.constant 3 : index
    %10 = arith.index_cast %0 : i32 to index
    %11 = memref.load %arg2[%c3, %10] : memref<5x16xf32, #tpu.memory_space<smem>>
    %c4 = arith.constant 4 : index
    %12 = arith.index_cast %0 : i32 to index
    %13 = memref.load %arg2[%c4, %12] : memref<5x16xf32, #tpu.memory_space<smem>>
    %c0_1 = arith.constant 0 : index
    %c0_2 = arith.constant 0 : index
    %14 = vector.load %arg10[%c0_1, %c0_2] : memref<8x128xf32, #tpu.memory_space<vmem>>, vector<8x128xf32>
    %15 = arith.truncf %14 : vector<8x128xf32> to vector<8x128xbf16>
    %c0_3 = arith.constant 0 : index
    %c0_4 = arith.constant 0 : index
    %16 = vector.load %arg4[%c0_3, %c0_4] : memref<32x8xbf16, #tpu.memory_space<vmem>>, vector<32x8xbf16>
    %cst = arith.constant dense<0.000000e+00> : vector<32x128xf32>
    %17 = tpu.matmul %16, %15, %cst {dimension_numbers = #tpu.dot_dimension_numbers<[1], [0], [0], [1], [0, 0, 1, 1], [], []>} : vector<32x8xbf16>, vector<8x128xbf16>, vector<32x128xf32> -> vector<32x128xf32>
    %c0_5 = arith.constant 0 : index
    %c0_6 = arith.constant 0 : index
    %c0_7 = arith.constant 0 : index
    %18 = vector.load %arg6[%c0_5, %c0_6, %c0_7] : memref<1x32x1xf32, #tpu.memory_space<vmem>>, vector<1x32x1xf32>
    %19 = vector.shape_cast %18 : vector<1x32x1xf32> to vector<32x1xf32>
    %20 = vector.broadcast %19 : vector<32x1xf32> to vector<32x128xf32>
    %21 = arith.addf %17, %20 : vector<32x128xf32>
    %22 = math.tanh %21 : vector<32x128xf32>
    %c0_8 = arith.constant 0 : index
    %c0_9 = arith.constant 0 : index
    %23 = vector.load %arg5[%c0_8, %c0_9] : memref<8x32xbf16, #tpu.memory_space<vmem>>, vector<8x32xbf16>
    %24 = arith.truncf %22 : vector<32x128xf32> to vector<32x128xbf16>
    %cst_10 = arith.constant dense<0.000000e+00> : vector<8x128xf32>
    %25 = tpu.matmul %23, %24, %cst_10 {dimension_numbers = #tpu.dot_dimension_numbers<[1], [0], [0], [1], [0, 0, 1, 1], [], []>} : vector<8x32xbf16>, vector<32x128xbf16>, vector<8x128xf32> -> vector<8x128xf32>
    %26 = vector.broadcast %5 : f32 to vector<8x128xf32>
    %27 = arith.mulf %26, %14 : vector<8x128xf32>
    %28 = vector.broadcast %7 : f32 to vector<8x128xf32>
    %29 = arith.mulf %28, %25 : vector<8x128xf32>
    %30 = arith.subf %27, %29 : vector<8x128xf32>
    %31 = vector.broadcast %9 : f32 to vector<8x128xf32>
    %32 = arith.mulf %31, %30 : vector<8x128xf32>
    %33 = vector.broadcast %11 : f32 to vector<8x128xf32>
    %34 = arith.mulf %33, %14 : vector<8x128xf32>
    %35 = arith.addf %32, %34 : vector<8x128xf32>
    %c0_11 = arith.constant 0 : index
    %c0_12 = arith.constant 0 : index
    %c0_13 = arith.constant 0 : index
    %36 = vector.load %arg7[%c0_11, %c0_12, %c0_13] : memref<1x8x128xf32, #tpu.memory_space<vmem>>, vector<1x8x128xf32>
    %37 = vector.shape_cast %36 : vector<1x8x128xf32> to vector<8x128xf32>
    %38 = vector.broadcast %13 : f32 to vector<8x128xf32>
    %39 = arith.mulf %38, %37 : vector<8x128xf32>
    %40 = arith.addf %35, %39 : vector<8x128xf32>
    %c0_14 = arith.constant 0 : index
    %c0_15 = arith.constant 0 : index
    %41 = vector.load %arg3[%c0_14, %c0_15] : memref<8x1xf32, #tpu.memory_space<vmem>>, vector<8x1xf32>
    %42 = vector.shape_cast %41 : vector<8x1xf32> to vector<8x1xf32>
    %43 = vector.broadcast %42 : vector<8x1xf32> to vector<8x128xf32>
    %cst_16 = arith.constant 0.000000e+00 : f32
    %44 = vector.broadcast %cst_16 : f32 to vector<8x128xf32>
    %45 = arith.cmpf one, %43, %44 : vector<8x128xf32>
    %46 = arith.select %45, %40, %14 : vector<8x128xi1>, vector<8x128xf32>
    %c0_17 = arith.constant 0 : index
    %c0_18 = arith.constant 0 : index
    %47 = vector.load %arg10[%c0_17, %c0_18] : memref<8x128xf32, #tpu.memory_space<vmem>>, vector<8x128xf32>
    tpu.vector_store %arg10[%c0_17, %c0_18], %46 {strides = array<i32>} : memref<8x128xf32, #tpu.memory_space<vmem>>, vector<8x128xf32>,
    %c15_i32_19 = arith.constant 15 : i32
    %48 = arith.cmpi eq, %arg1, %c15_i32_19 : i32
    %49 = arith.extui %48 : i1 to i32
    %c0_i32_20 = arith.constant 0 : i32
    %50 = arith.cmpi ne, %49, %c0_i32_20 : i32
    scf.if %50 {
      %c0_21 = arith.constant 0 : index
      %c0_22 = arith.constant 0 : index
      %51 = vector.load %arg10[%c0_21, %c0_22] : memref<8x128xf32, #tpu.memory_space<vmem>>, vector<8x128xf32>
      %c0_23 = arith.constant 0 : index
      %c0_24 = arith.constant 0 : index
      %52 = vector.load %arg9[%c0_23, %c0_24] : memref<8x128xf32, #tpu.memory_space<vmem>>, vector<8x128xf32>
      tpu.vector_store %arg9[%c0_23, %c0_24], %51 {strides = array<i32>} : memref<8x128xf32, #tpu.memory_space<vmem>>, vector<8x128xf32>,
    } else {
    }
    return
  }
  func.func @transform_0(%arg0: i32, %arg1: i32) -> (i32, i32) {
    %c0_i32 = arith.constant 0 : i32
    %c0_i32_0 = arith.constant 0 : i32
    %c0_i32_1 = arith.constant 0 : i32
    return %c0_i32, %c0_i32_0 : i32, i32
  }
  func.func @transform_1(%arg0: i32, %arg1: i32) -> (i32, i32) {
    %c0_i32 = arith.constant 0 : i32
    %c0_i32_0 = arith.constant 0 : i32
    %c0_i32_1 = arith.constant 0 : i32
    return %c0_i32, %c0_i32_0 : i32, i32
  }
  func.func @transform_2(%arg0: i32, %arg1: i32) -> (i32, i32) {
    %c0_i32 = arith.constant 0 : i32
    %c0_i32_0 = arith.constant 0 : i32
    %c0_i32_1 = arith.constant 0 : i32
    return %c0_i32, %c0_i32_0 : i32, i32
  }
  func.func @transform_3(%arg0: i32, %arg1: i32) -> (i32, i32) {
    %c0_i32 = arith.constant 0 : i32
    %c0_i32_0 = arith.constant 0 : i32
    %c0_i32_1 = arith.constant 0 : i32
    return %c0_i32, %c0_i32_0 : i32, i32
  }
  func.func @transform_4(%arg0: i32, %arg1: i32) -> (i32, i32, i32) {
    %c15_i32 = arith.constant 15 : i32
    %0 = arith.subi %c15_i32, %arg1 : i32
    %c0_i32 = arith.constant 0 : i32
    %c0_i32_0 = arith.constant 0 : i32
    %c0_i32_1 = arith.constant 0 : i32
    return %0, %c0_i32, %c0_i32_0 : i32, i32, i32
  }
  func.func @transform_5(%arg0: i32, %arg1: i32) -> (i32, i32, i32) {
    %c15_i32 = arith.constant 15 : i32
    %0 = arith.subi %c15_i32, %arg1 : i32
    %c0_i32 = arith.constant 0 : i32
    %c0_i32_0 = arith.constant 0 : i32
    return %0, %c0_i32, %arg0 : i32, i32, i32
  }
  func.func @transform_6(%arg0: i32, %arg1: i32) -> (i32, i32) {
    %c0_i32 = arith.constant 0 : i32
    %c0_i32_0 = arith.constant 0 : i32
    return %c0_i32, %arg0 : i32, i32
  }
  func.func @transform_7(%arg0: i32, %arg1: i32) -> (i32, i32) {
    %c0_i32 = arith.constant 0 : i32
    %c0_i32_0 = arith.constant 0 : i32
    return %c0_i32, %arg0 : i32, i32
  }
}

</mosaic_0001>

<bundles_post_ra>
// kernel: tpu_custom_call.1
= control target key start
LH: loop header
LB: loop body
LE: loop exit
PB: predicated region body
PF: predicated region fallthrough
CT: control target
= control target key end

     0   :  { %12 = vsyncpa [#allocation5], 0  ;;  %s1017_s0 = inlined_call_operand.vmem [shape: f32[5,16], index: 0, kind: input, shape index: {}]   ;;  %s1018_s1 = inlined_call_operand.vmem [shape: f32[8,1], index: 1, kind: input, shape index: {}]   ;;  %s1019_s2 = inlined_call_operand.vmem [shape: bf16[32,8], index: 2, kind: input, shape index: {}]   ;;  %s1020_s3 = inlined_call_operand.vmem [shape: bf16[8,32], index: 3, kind: input, shape index: {}]   ;;  %s1021_s4 = inlined_call_operand.vmem [shape: f32[16,32,1], index: 4, kind: input, shape index: {}]   ;;  %s1022_s5 = inlined_call_operand.vmem [shape: f32[16,8,128], index: 5, kind: input, shape index: {}]   ;;  %s1023_s6 = inlined_call_operand.vmem [shape: f32[8,128], index: 6, kind: input, shape index: {}]   ;;  %s1024_s7 = inlined_call_operand.hbm [shape: f32[8,128], index: 7, kind: output, shape index: {}]  }
   0x1   :  { %13 = vsyncpa [#allocation4], 0  ;;  %s895_s24 = smov 0   ;;  %s897_s25 = smov 0  }
   0x2   :  { %s899_s26 = smov 0  }
   0x3 LB: > { %s1025_s27 = sadd.s32 4294967295, %s848_s26   ;;  %s28_s28 = sadd.s32 1, %s844_s25  ;;  %s848_s26 = sphi %s899_s26, %s19_s26   ;;  %s844_s25 = sphi %s897_s25, %s1031_s25   ;;  %s840_s24 = sphi %s895_s24, %s1030_s24  }
   0x4   : > { %p29_p0 = scmp.ge.s32.totalorder %s28_s28, 16  ;;  %p666_p1 = scmp.ge.s32.totalorder %s848_s26, 1 }
   0x5   : > { %p230_p2 = scmp.lt.s32.totalorder %s848_s26, 17  ;;  %p922_p4 = scmp.eq.s32.totalorder %s1025_s27, 0 }
   0x6   : > { %s1033_s28 = smov (%p29_p0, %s28_s28), 0  ;;  %s243_s10 = sshll.u32 %s1017_s0, 4  ;;  %s244_s10 = int_to_ptr.vmem [resolvable:$true] %s243_s10 }
   0x7   : > { %p916_p3 = pnand %p666_p1, %p230_p2  ;;  %s777_s11 = scalar_lea.vmem %s244_s10, 128 }
   0x8   : > { %p778_p7 = scmp.ne.s32.totalorder %s244_s10, %s777_s11  ;;  %p785_p11 = scmp.lt.s32.totalorder %s244_s10, %s244_s10 }
   0x9   : > { %p728_p5 = pneg %p916_p3  ;;  %p786_p12 = scmp.lt.s32.totalorder %s777_s11, %s777_s11 }
   0xb   : > { %p729_p6 = pnand %p922_p4, %p728_p5  ;;  %p787_p13 = por %p786_p12, %p785_p11 }
   0xd   : > { %p779_p8 = pneg %p729_p6 }
   0xf   : > { %p780_p9 = pnand %p779_p8, %p778_p7 }
  0x11   : > { %p781_p10 = pneg %p780_p9 }
  0x13   : > { %p788_p0 = pnand %p787_p13, %p781_p10 }
  0x15   : > { %791 = shalt.err (!%p788_p0)
}
  0x16   : > { %s850_s12 = smov [#allocation3]   ;;  %294 = sbr.rel (%p916_p3) target bundleno = 542 (0x21e), region = 48 }
  0x17   : > { %731 = dma.vmem_to_smem (!%p729_p6), %s244_s10, 128, %s850_s12, [#allocation5]  }
  0x1d   : > { %831 = dma.done.wait (%p922_p4), [#allocation5], 128  }
  0x1e   : > { %833 = vsyncadd (%p922_p4), [#allocation5], 4294967168 }
  0x1f   : > { %300 = sfence }
  0x20   : > { %s940_s13 = ssub.s32 15, %s840_s24  ;;  %p675_p2 = scmp.ne.s32.totalorder %s840_s24, 0 }
  0x21   : > { %p336_p1 = scmp.lt.s32.totalorder %s940_s13, 15  ;;  %v361_v0 = vld [vmem:[%s1023_s6] sm:$0xff] (!%p675_p2) }
  0x22   : > { %360 = sbr.rel (%p675_p2) target bundleno = 41 (0x29), region = 56  ;;  %362 = vst [vmem:[#allocation2] sm:$0xff] (!%p675_p2), %v361_v0 }
  0x23   : > { %s337_s14 = scalar_select %p336_p1, %s940_s13, 15 }
  0x25   : > { %s690_s15 = sshll.u32 %s337_s14, 5  ;;  %s674_s16 = sshll.u32 %s337_s14, 3 }
  0x26   : > { %s340_s19 = scalar_lea.vmem %s1021_s4, %s690_s15  ;;  %s950_s22 = scalar_lea.vmem %s1022_s5, %s674_s16 }
  0x29 PF: > { %v956_v1 = vld [vmem:[#allocation2] sm:$0xff]  ;;  %vm431_vm0 = vcmask 1043456   ;;  %vm424_vm1 = vcmask 64512   ;;  %v768_v6 = vld [vmem:[%s1019_s2 + $0x8] sm:$0xff]   ;;  %v392_v7 = vld [vmem:[%s340_s19 + $0x10] sm:$0xff]  ;;  %v851_v8 = vmov 0  }
  0x2a   : > { %v385_v2 = vpack.c.bf16 %v956_v1, %v956_v1  ;;  %v767_v3 = vld [vmem:[%s1019_s2] sm:$0xff]   ;;  %765 = vset.pattern.permute.xlu0 %v851_v8  ;;  %766 = vset.pattern.permute.xlu1 %v851_v8  ;;  %v391_v9 = vld [vmem:[%s340_s19 + $0x8] sm:$0xff]  ;;  %v393_v10 = vld [vmem:[%s340_s19 + $0x18] sm:$0xff]  ;;  %v852_v12 = vmov 0.0   ;;  %vm853_vm2 = vmmov 0   ;;  %vm491_vm3 = vcmask 261120  }
  0x2b   : > { %v390_v4 = vld [vmem:[%s340_s19] sm:$0xff]  ;;  %707 = vmatprep.mubr.msk.bf16.mxu0 %vm424_vm1, %v767_v3  ;;  %406 = vperm.xlu1 %766, %v392_v7   ;;  %s364_s16 = sshra.s32 %s940_s13, 7  ;;  %s369_s19 = sand.u32 127, %s940_s13 }
  0x2c   : > { %719 = vmatprep.subr.msk.bf16.mxu0 %vm431_vm0, %v385_v2  ;;  %v433_v5 = vsel %vm431_vm0, %v385_v2, 0  ;;  %396 = vperm.xlu0 %765, %v390_v4   ;;  %v549_v11 = vld [vmem:[%s1018_s1] sm:$0xff]  ;;  %s691_s17 = sshll.u32 %s364_s16, 7  ;;  %s363_s21 = sld [smem:[#allocation3 + %s940_s13]] }
  0x2d   : > { %706 = vmatpush3.bf16.msra.mxu0 %v433_v5  ;;  %711 = vmatprep.subr.bf16.mxu1 %v852_v12  ;;  %v488_v31 = vld [vmem:[%s1020_s3] sm:$0xf]  ;;  %s692_s18 = sadd.s32 128, %s691_s17  ;;  %s696_s20 = sadd.s32 384, %s691_s17 }
  0x2e   : > { %715 = vmatprep.mubr.msk.bf16.mxu1 %vm853_vm2, %v852_v12  ;;  %s370_s23 = sadd.s32 %s692_s18, %s369_s19  ;;  %s694_s29 = sadd.s32 256, %s691_s17  ;;  %v545_v40 = vld [vmem:[%s950_s22] sm:$0xff] }
  0x2f   : > { %411 = vperm.xlu1 %766, %v393_v10   ;;  %s698_s30 = sadd.s32 512, %s691_s17  ;;  %s378_s8 = sadd.s32 %s696_s20, %s369_s19 }
  0x30   : > { %708 = vmatmul.mubr.msk.bf16.vlgmr.msra.gmra.mrb[0].mxu0 %vm424_vm1, %v768_v6  ;;  %401 = vperm.xlu0 %765, %v391_v9   ;;  %s371_s9 = sld [smem:[#allocation3 + %s370_s23]]  ;;  %s374_s10 = sadd.s32 %s694_s29, %s369_s19 }
  0x31   : > { %s382_s11 = sadd.s32 %s698_s30, %s369_s19  ;;  %s379_s12 = sld [smem:[#allocation3 + %s378_s8]] }
  0x32   : > { %s375_s27 = sld [smem:[#allocation3 + %s374_s10]]  ;;  %v535_v32 = vstv %s363_s21  ;;  %p685_p3 = scmp.ne.s32.totalorder %s840_s24, 15 }
  0x33   : > { %s383_s14 = sld [smem:[#allocation3 + %s382_s11]]  ;;  %v536_v34 = vmul.f32 %v535_v32, %v956_v1 }
  0x34   : > { %552 = vperm.xlu0 %765, %v549_v11  }
  0x36   : > { %v537_v33 = vstv %s371_s9 }
  0x37   : > { %v542_v36 = vstv %s379_s12 }
  0x38   : > { %v540_v39 = vstv %s375_s27  ;;  %v543_v44 = vmul.f32 %v542_v36, %v956_v1 }
  0x39   : > { %v546_v41 = vstv %s383_s14 }
  0x3a   : > { %v547_v47 = vmul.f32 %v546_v41, %v545_v40 }
  0xaa   : > { %v407_v13 = vpop.permute.xlu1 %406 }
  0xab   : > { %v397_v14 = vpop.permute.xlu0 %396 }
  0xae   : > { %v412_v16 = vpop.permute.xlu1 %411 }
  0xaf   : > { %v402_v21 = vpop.permute.xlu0 %401 }
  0xb3   : > { %v553_v48 = vpop.permute.xlu0 %552 }
  0xb4   : > { %vm555_vm4 = vcmp.ne.f32.partialorder %v553_v48, 0.0 }
 0x103   : > { %v709_v15 = vpop.f32.mrb[0].mxu0 }
 0x104   : > { %v478_v17 = vadd.f32 %v709_v15, %v407_v13  ;;  %v469_v18 = vpop.f32.mrb[1].mxu0 }
 0x105   : > { %v470_v19 = vadd.f32 %v469_v18, %v397_v14  ;;  %v710_v20 = vpop.f32.mrb[2].mxu0 }
 0x106   : > { %769 = vtanh.f32 %v478_v17  ;;  %v481_v22 = vadd.f32 %v710_v20, %v412_v16  ;;  %v472_v23 = vpop.f32.mrb[3].mxu0 }
 0x107   : > { %771 = vtanh.f32 %v470_v19  ;;  %v473_v24 = vadd.f32 %v472_v23, %v402_v21 }
 0x108   : > { %773 = vtanh.f32 %v481_v22 }
 0x109   : > { %775 = vtanh.f32 %v473_v24 }
 0x110   : > { %v770_v25 = vpop.eup %769 }
 0x111   : > { %v772_v26 = vpop.eup %771 }
 0x112   : > { %v774_v27 = vpop.eup %773 }
 0x113   : > { %v776_v28 = vpop.eup %775  ;;  %v490_v29 = vpack.c.bf16 %v774_v27, %v770_v25 }
 0x114   : > { %v489_v30 = vpack.c.bf16 %v776_v28, %v772_v26 }
 0x116   : > { %712 = vmatpush3.bf16.msra.mxu1 %v489_v30 }
 0x117   : > { %713 = vmatprep.subr.bf16.mxu1 %v852_v12 }
 0x11a   : > { %714 = vmatpush3.bf16.msra.mxu1 %v490_v29 }
 0x11d   : > { %716 = vmatmul.mubr.msk.bf16.vlgmr.msra.gmra.mrb[0].mxu1 %vm491_vm3, %v488_v31 }
 0x1f0   : > { %v529_v35 = vpop.f32.mrb[0].mxu1 }
 0x1f1   : > { %v538_v37 = vmul.f32 %v537_v33, %v529_v35  ;;  %v717_v38 = vpop.f32.mrb[1].mxu1 }
 0x1f2   : > { %v532_v42 = vpop.f32.mrb[2].mxu1 }
 0x1f3   : > { %v539_v43 = vsub.f32 %v536_v34, %v538_v37  ;;  %v718_v45 = vpop.f32.mrb[3].mxu1 }
 0x1f5   : > { %v541_v46 = vmul.f32 %v540_v39, %v539_v43 }
 0x1f6   : > { %561 = sbr.rel (%p685_p3) target bundleno = 517 (0x205), region = 60 }
 0x1f7   : > { %v544_v49 = vadd.f32 %v543_v44, %v541_v46 }
 0x1f9   : > { %v548_v50 = vadd.f32 %v547_v47, %v544_v49 }
 0x1fb   : > { %v556_v51 = vsel %vm555_vm4, %v548_v50, %v956_v1 }
 0x1fc   : > { %557 = vst [vmem:[#allocation2] sm:$0xff] %v556_v51 }
 0x203   : > { %v562_v52 = vld [vmem:[#allocation2] sm:$0xff] }
 0x204   : > { %563 = vst [vmem:[#allocation6] sm:$0xff] %v562_v52 }
 0x205 PF: > { %s1028_s27 = sadd.s32 4294967295, %s848_s26   ;;  %s854_s22 = smov [#allocation6]  }
 0x206   : > { %p982_p4 = scmp.eq.s32.totalorder %s1028_s27, 15  ;;  %s573_s15 = sshll.u32 %s854_s22, 4  ;;  %s574_s15 = int_to_ptr.vmem [resolvable:$true] %s573_s15 }
 0x207   : > { %s792_s16 = scalar_lea.vmem %s574_s15, 128  ;;  %p799_p8 = scmp.lt.s32.totalorder %s574_s15, %s574_s15 }
 0x208   : > { %p793_p5 = scmp.ne.s32.totalorder %s574_s15, %s792_s16  ;;  %p800_p9 = scmp.lt.s32.totalorder %s792_s16, %s792_s16 }
 0x20a   : > { %p794_p6 = pnand %p793_p5, %p982_p4  ;;  %p801_p10 = por %p800_p9, %p799_p8 }
 0x20c   : > { %p795_p7 = pneg %p794_p6 }
 0x20e   : > { %p802_p11 = pnand %p801_p10, %p795_p7 }
 0x210   : > { %805 = shalt.err (!%p802_p11)
}
 0x211   : > { %s806_s18 = scalar_lea.hbm %s1024_s7, 128 }
 0x212   : > { %p807_p12 = scmp.ne.s32.totalorder %s1024_s7, %s806_s18  ;;  %p812_p1 = scmp.lt.u32.totalorder %s806_s18, %s1024_s7 }
 0x214   : > { %p808_p13 = pnand %p807_p12, %p982_p4 }
 0x216   : > { %p809_p0 = pneg %p808_p13 }
 0x218   : > { %p814_p2 = pnand %p812_p1, %p809_p0 }
 0x21a   : > { %817 = shalt.err (!%p814_p2)
}
 0x21b   : > { %725 = dma.vmem_to_hbm [thread:$0]  (%p982_p4), %s574_s15, 128, %s1024_s7, [#allocation4]  }
 0x21c   : > { %835 = dma.done.wait (%p982_p4), [#allocation4], 128  }
 0x21d   : > { %837 = vsyncadd (%p982_p4), [#allocation4], 4294967168 }
 0x21e PF: > { %s19_s26 = sadd.s32 1, %s848_s26   ;;  %s1030_s24 = smov %s844_s25 }
 0x21f   : > { %p16_p3 = scmp.ge.s32.totalorder %s19_s26, 18   ;;  %s1031_s25 = smov %s1033_s28 }
 0x221   :  { %18 = sbr.rel (!%p16_p3) target bundleno = 3 (0x3), region = 95 }
 0x228   :  { %586 = vsyncpa [#allocation4], 1 }
 0x229   :  { %588 = vsyncpa [#allocation4 + $0x1], 1 }
 0x22a   :  { %589 = vsyncpa [#allocation5], 1 }
 0x22b   :  { %591 = vsyncpa [#allocation5 + $0x1], 1 }

</bundles_post_ra>
